<compile_context>
chip_gen: v7x
topology: tpu7x:2x2x1
jax: 0.10.0
libtpu: 0.0.40
codegen_flags: <defaults>
</compile_context>

<pallas_src>
import jax
import jax.numpy as jnp
from jax.experimental import pallas as pl
from jax.experimental.pallas import tpu as pltpu

HIDDEN = 200      # logical hidden width (PyTorch spec)
HIDDEN_P = 256    # padded to a multiple of 128


def _round_up(x, m):
    return ((x + m - 1) // m) * m


def _mlp_kernel(x_ref, w1_ref, b1_ref, w2_ref, b2_ref, w3_ref, b3_ref,
                y_ref, h2_ref):
    # bf16 matmul inputs -> MXU, f32 accumulation, f32 elementwise epilogues.
    x = x_ref[...]                                               # (TB, D_in_p) bf16

    h1 = jnp.dot(x, w1_ref[...], preferred_element_type=jnp.float32)
    h1 = jnp.maximum(h1 + b1_ref[...], 0.0)                      # ReLU (f32, VPU)

    h2 = jnp.dot(h1.astype(jnp.bfloat16), w2_ref[...],
                 preferred_element_type=jnp.float32)
    h2 = jnp.maximum(h2 + b2_ref[...], 0.0)                      # ReLU (f32, VPU)

    y = jnp.dot(h2.astype(jnp.bfloat16), w3_ref[...],
                preferred_element_type=jnp.float32)
    y = y + b3_ref[...]

    y_ref[...] = y.astype(y_ref.dtype)
    h2_ref[...] = h2.astype(h2_ref.dtype)


def prepare_params(params):
    """Zero-pad feature dims to multiples of 128 and cast weights to bf16.

    Done once outside the hot path. Padded weight columns / bias lanes are
    zero, so padded output lanes are exactly zero and can be sliced away.
    """
    w1, b1, w2, b2, w3, b3 = params
    d_in, d_out = int(w1.shape[0]), int(w3.shape[1])
    d_in_p = _round_up(d_in, 128)
    d_out_p = _round_up(d_out, 128)

    def pad2d(a, shape, dtype):
        out = jnp.zeros(shape, dtype)
        return out.at[: a.shape[0], : a.shape[1]].set(a.astype(dtype))

    padded = (
        pad2d(w1, (d_in_p, HIDDEN_P), jnp.bfloat16),
        pad2d(b1, (1, HIDDEN_P), jnp.float32),
        pad2d(w2, (HIDDEN_P, HIDDEN_P), jnp.bfloat16),
        pad2d(b2, (1, HIDDEN_P), jnp.float32),
        pad2d(w3, (HIDDEN_P, d_out_p), jnp.bfloat16),
        pad2d(b3, (1, d_out_p), jnp.float32),
    )
    return padded, (d_in, d_out)


def mlp_forward(x, padded_params, logical_dims, *, batch_tile=512):
    """x: (B, ...) flattened like x.view(x.shape[0], -1). Returns (y_pred, h_2)."""
    w1, b1, w2, b2, w3, b3 = padded_params
    d_in, d_out = logical_dims

    B = x.shape[0]
    x2d = x.reshape(B, -1)
    assert x2d.shape[1] == d_in, (x2d.shape, d_in)

    d_in_p, h_p = w1.shape
    d_out_p = w3.shape[1]

    # Batch tile: TB=512 keeps resident weights (~0.7 MiB bf16) + double-
    # buffered activation tiles (~4 MiB) comfortably inside v7x's 64 MiB VMEM
    # while giving near-roofline DMA efficiency on v5e/v6e.
    tb = min(batch_tile, _round_up(B, 8))
    b_p = _round_up(B, tb)

    # Pad batch + feature dims; cast the x stream to bf16 (halves HBM bytes).
    x_pad = jnp.zeros((b_p, d_in_p), jnp.bfloat16)
    x_pad = x_pad.at[:B, :d_in].set(x2d.astype(jnp.bfloat16))

    grid = (b_p // tb,)

    def act_spec(cols):                       # tiled over the batch axis
        return pl.BlockSpec((tb, cols), lambda i: (i, 0))

    def resident_spec(shape):                 # same block every step -> VMEM-resident
        return pl.BlockSpec(shape, lambda i: (0, 0))

    y_p, h2_p = pl.pallas_call(
        _mlp_kernel,
        grid=grid,
        out_shape=(
            jax.ShapeDtypeStruct((b_p, d_out_p), jnp.float32),
            jax.ShapeDtypeStruct((b_p, h_p), jnp.float32),
        ),
        in_specs=[
            act_spec(d_in_p),
            resident_spec((d_in_p, h_p)), resident_spec((1, h_p)),
            resident_spec((h_p, h_p)),    resident_spec((1, h_p)),
            resident_spec((h_p, d_out_p)), resident_spec((1, d_out_p)),
        ],
        out_specs=(
            act_spec(d_out_p),
            act_spec(h_p),
        ),
        compiler_params=pltpu.CompilerParams(
            dimension_semantics=("parallel",),    # megacore sharding on v7x
        ),
    )(x_pad, w1, b1, w2, b2, w3, b3)

    # Slice padded rows / lanes back to the logical shapes.
    return y_p[:B, :d_out], h2_p[:B, :HIDDEN]


def init_params(key, input_dim, output_dim):
    """nn.Linear-style U(-1/sqrt(fan_in), 1/sqrt(fan_in)) init, (in, out) layout."""
    def linear(k, fan_in, fan_out):
        kw, kb = jax.random.split(k)
        bound = 1.0 / jnp.sqrt(fan_in)
        w = jax.random.uniform(kw, (fan_in, fan_out), jnp.float32, -bound, bound)
        b = jax.random.uniform(kb, (1, fan_out), jnp.float32, -bound, bound)
        return w, b

    k1, k2, k3 = jax.random.split(key, 3)
    w1, b1 = linear(k1, input_dim, HIDDEN)
    w2, b2 = linear(k2, HIDDEN, HIDDEN)
    w3, b3 = linear(k3, HIDDEN, output_dim)
    return (w1, b1, w2, b2, w3, b3)


if __name__ == "__main__":
    key = jax.random.PRNGKey(0)
    k_x, k_p = jax.random.split(key)

    # Example input: (B=2, C=4, H=16, W=16) -> flattened input_dim = 1024.
    # NOTE: at B=2 the call is launch/DMA-latency bound; the grid / padding /
    # bf16 choices pay off at realistic batch sizes.
    B, C, H, W = 2, 4, 16, 16
    input_dim = C * H * W
    output_dim = 10

    x = jax.random.normal(k_x, (B, C, H, W), jnp.float32)
    params = init_params(k_p, input_dim, output_dim)
    padded_params, logical_dims = prepare_params(params)

    y_pred, h_2 = mlp_forward(x, padded_params, logical_dims)
    jax.block_until_ready((y_pred, h_2))

    # Reference in plain JAX using the same bf16-input / f32-accumulate math.
    w1, b1, w2, b2, w3, b3 = params
    x2d = x.reshape(B, -1)

    def dot_bf16(a, w):
        return jnp.dot(a.astype(jnp.bfloat16), w.astype(jnp.bfloat16),
                       preferred_element_type=jnp.float32)

    h1_ref = jnp.maximum(dot_bf16(x2d, w1) + b1, 0.0)
    h2_ref = jnp.maximum(dot_bf16(h1_ref, w2) + b2, 0.0)
    y_ref = dot_bf16(h2_ref, w3) + b3

    assert y_pred.shape == (B, output_dim) and h_2.shape == (B, HIDDEN)
    assert jnp.allclose(y_pred, y_ref, atol=5e-3, rtol=5e-3)
    assert jnp.allclose(h_2, h2_ref, atol=5e-3, rtol=5e-3)

    print("KERNEL_OK")
</pallas_src>

<mosaic_0001>
module attributes {stable_mosaic.version = 11 : i64} {
  func.func @_mlp_kernel(%arg0: i32, %arg1: memref<8x1024xbf16, #tpu.memory_space<vmem>>, %arg2: memref<1024x256xbf16, #tpu.memory_space<vmem>>, %arg3: memref<1x256xf32, #tpu.memory_space<vmem>>, %arg4: memref<256x256xbf16, #tpu.memory_space<vmem>>, %arg5: memref<1x256xf32, #tpu.memory_space<vmem>>, %arg6: memref<256x128xbf16, #tpu.memory_space<vmem>>, %arg7: memref<1x128xf32, #tpu.memory_space<vmem>>, %arg8: memref<8x128xf32, #tpu.memory_space<vmem>>, %arg9: memref<8x256xf32, #tpu.memory_space<vmem>>) attributes {dimension_semantics = [#tpu.dimension_semantics<parallel>], iteration_bounds = array<i64: 1>, scalar_prefetch = 0 : i64, scratch_operands = 0 : i64, tpu.core_type = #tpu.core_type<tc>, window_params = [{transform_indices = @transform_0, window_bounds = array<i64: 8, 1024>}, {pipeline_mode = #tpu.pipeline_mode<synchronous>, transform_indices = @transform_1, window_bounds = array<i64: 1024, 256>}, {pipeline_mode = #tpu.pipeline_mode<synchronous>, transform_indices = @transform_2, window_bounds = array<i64: 1, 256>}, {pipeline_mode = #tpu.pipeline_mode<synchronous>, transform_indices = @transform_3, window_bounds = array<i64: 256, 256>}, {pipeline_mode = #tpu.pipeline_mode<synchronous>, transform_indices = @transform_4, window_bounds = array<i64: 1, 256>}, {pipeline_mode = #tpu.pipeline_mode<synchronous>, transform_indices = @transform_5, window_bounds = array<i64: 256, 128>}, {pipeline_mode = #tpu.pipeline_mode<synchronous>, transform_indices = @transform_6, window_bounds = array<i64: 1, 128>}, {transform_indices = @transform_7, window_bounds = array<i64: 8, 128>}, {transform_indices = @transform_8, window_bounds = array<i64: 8, 256>}]} {
    %c0 = arith.constant 0 : index
    %c0_0 = arith.constant 0 : index
    %0 = vector.load %arg1[%c0, %c0_0] : memref<8x1024xbf16, #tpu.memory_space<vmem>>, vector<8x1024xbf16>
    %c0_1 = arith.constant 0 : index
    %c0_2 = arith.constant 0 : index
    %1 = vector.load %arg2[%c0_1, %c0_2] : memref<1024x256xbf16, #tpu.memory_space<vmem>>, vector<1024x256xbf16>
    %cst = arith.constant dense<0.000000e+00> : vector<8x256xf32>
    %2 = tpu.matmul %0, %1, %cst {dimension_numbers = #tpu.dot_dimension_numbers<[1], [0], [0], [1], [0, 0, 1, 1], [], []>} : vector<8x1024xbf16>, vector<1024x256xbf16>, vector<8x256xf32> -> vector<8x256xf32>
    %c0_3 = arith.constant 0 : index
    %c0_4 = arith.constant 0 : index
    %3 = vector.load %arg3[%c0_3, %c0_4] : memref<1x256xf32, #tpu.memory_space<vmem>>, vector<1x256xf32>
    %4 = vector.broadcast %3 : vector<1x256xf32> to vector<8x256xf32>
    %5 = arith.addf %2, %4 : vector<8x256xf32>
    %cst_5 = arith.constant 0.000000e+00 : f32
    %6 = vector.broadcast %cst_5 : f32 to vector<8x256xf32>
    %7 = arith.maximumf %5, %6 : vector<8x256xf32>
    %8 = arith.truncf %7 : vector<8x256xf32> to vector<8x256xbf16>
    %c0_6 = arith.constant 0 : index
    %c0_7 = arith.constant 0 : index
    %9 = vector.load %arg4[%c0_6, %c0_7] : memref<256x256xbf16, #tpu.memory_space<vmem>>, vector<256x256xbf16>
    %cst_8 = arith.constant dense<0.000000e+00> : vector<8x256xf32>
    %10 = tpu.matmul %8, %9, %cst_8 {dimension_numbers = #tpu.dot_dimension_numbers<[1], [0], [0], [1], [0, 0, 1, 1], [], []>} : vector<8x256xbf16>, vector<256x256xbf16>, vector<8x256xf32> -> vector<8x256xf32>
    %c0_9 = arith.constant 0 : index
    %c0_10 = arith.constant 0 : index
    %11 = vector.load %arg5[%c0_9, %c0_10] : memref<1x256xf32, #tpu.memory_space<vmem>>, vector<1x256xf32>
    %12 = vector.broadcast %11 : vector<1x256xf32> to vector<8x256xf32>
    %13 = arith.addf %10, %12 : vector<8x256xf32>
    %cst_11 = arith.constant 0.000000e+00 : f32
    %14 = vector.broadcast %cst_11 : f32 to vector<8x256xf32>
    %15 = arith.maximumf %13, %14 : vector<8x256xf32>
    %16 = arith.truncf %15 : vector<8x256xf32> to vector<8x256xbf16>
    %c0_12 = arith.constant 0 : index
    %c0_13 = arith.constant 0 : index
    %17 = vector.load %arg6[%c0_12, %c0_13] : memref<256x128xbf16, #tpu.memory_space<vmem>>, vector<256x128xbf16>
    %cst_14 = arith.constant dense<0.000000e+00> : vector<8x128xf32>
    %18 = tpu.matmul %16, %17, %cst_14 {dimension_numbers = #tpu.dot_dimension_numbers<[1], [0], [0], [1], [0, 0, 1, 1], [], []>} : vector<8x256xbf16>, vector<256x128xbf16>, vector<8x128xf32> -> vector<8x128xf32>
    %c0_15 = arith.constant 0 : index
    %c0_16 = arith.constant 0 : index
    %19 = vector.load %arg7[%c0_15, %c0_16] : memref<1x128xf32, #tpu.memory_space<vmem>>, vector<1x128xf32>
    %20 = vector.broadcast %19 : vector<1x128xf32> to vector<8x128xf32>
    %21 = arith.addf %18, %20 : vector<8x128xf32>
    %c0_17 = arith.constant 0 : index
    %c0_18 = arith.constant 0 : index
    %22 = vector.load %arg8[%c0_17, %c0_18] : memref<8x128xf32, #tpu.memory_space<vmem>>, vector<8x128xf32>
    tpu.vector_store %arg8[%c0_17, %c0_18], %21 {strides = array<i32>} : memref<8x128xf32, #tpu.memory_space<vmem>>, vector<8x128xf32>,
    %c0_19 = arith.constant 0 : index
    %c0_20 = arith.constant 0 : index
    %23 = vector.load %arg9[%c0_19, %c0_20] : memref<8x256xf32, #tpu.memory_space<vmem>>, vector<8x256xf32>
    tpu.vector_store %arg9[%c0_19, %c0_20], %15 {strides = array<i32>} : memref<8x256xf32, #tpu.memory_space<vmem>>, vector<8x256xf32>,
    return
  }
  func.func @transform_0(%arg0: i32) -> (i32, i32) {
    %c0_i32 = arith.constant 0 : i32
    %c0_i32_0 = arith.constant 0 : i32
    return %arg0, %c0_i32 : i32, i32
  }
  func.func @transform_1(%arg0: i32) -> (i32, i32) {
    %c0_i32 = arith.constant 0 : i32
    %c0_i32_0 = arith.constant 0 : i32
    %c0_i32_1 = arith.constant 0 : i32
    return %c0_i32, %c0_i32_0 : i32, i32
  }
  func.func @transform_2(%arg0: i32) -> (i32, i32) {
    %c0_i32 = arith.constant 0 : i32
    %c0_i32_0 = arith.constant 0 : i32
    %c0_i32_1 = arith.constant 0 : i32
    return %c0_i32, %c0_i32_0 : i32, i32
  }
  func.func @transform_3(%arg0: i32) -> (i32, i32) {
    %c0_i32 = arith.constant 0 : i32
    %c0_i32_0 = arith.constant 0 : i32
    %c0_i32_1 = arith.constant 0 : i32
    return %c0_i32, %c0_i32_0 : i32, i32
  }
  func.func @transform_4(%arg0: i32) -> (i32, i32) {
    %c0_i32 = arith.constant 0 : i32
    %c0_i32_0 = arith.constant 0 : i32
    %c0_i32_1 = arith.constant 0 : i32
    return %c0_i32, %c0_i32_0 : i32, i32
  }
  func.func @transform_5(%arg0: i32) -> (i32, i32) {
    %c0_i32 = arith.constant 0 : i32
    %c0_i32_0 = arith.constant 0 : i32
    %c0_i32_1 = arith.constant 0 : i32
    return %c0_i32, %c0_i32_0 : i32, i32
  }
  func.func @transform_6(%arg0: i32) -> (i32, i32) {
    %c0_i32 = arith.constant 0 : i32
    %c0_i32_0 = arith.constant 0 : i32
    %c0_i32_1 = arith.constant 0 : i32
    return %c0_i32, %c0_i32_0 : i32, i32
  }
  func.func @transform_7(%arg0: i32) -> (i32, i32) {
    %c0_i32 = arith.constant 0 : i32
    %c0_i32_0 = arith.constant 0 : i32
    return %arg0, %c0_i32 : i32, i32
  }
  func.func @transform_8(%arg0: i32) -> (i32, i32) {
    %c0_i32 = arith.constant 0 : i32
    %c0_i32_0 = arith.constant 0 : i32
    return %arg0, %c0_i32 : i32, i32
  }
}

</mosaic_0001>

<bundles_post_ra>
// kernel: tpu_custom_call.1
= control target key start
LH: loop header
LB: loop body
LE: loop exit
PB: predicated region body
PF: predicated region fallthrough
CT: control target
= control target key end

     0   :  { %14 = vsyncpa [#allocation3], 0  ;;  %s2317_s0 = inlined_call_operand.hbm [shape: bf16[8,1024], index: 0, kind: input, shape index: {}]   ;;  %s2318_s1 = inlined_call_operand.hbm [shape: bf16[1024,256], index: 1, kind: input, shape index: {}]   ;;  %s2319_s2 = inlined_call_operand.vmem [shape: f32[1,256], index: 2, kind: input, shape index: {}]   ;;  %s2320_s3 = inlined_call_operand.hbm [shape: bf16[256,256], index: 3, kind: input, shape index: {}]   ;;  %s2321_s4 = inlined_call_operand.vmem [shape: f32[1,256], index: 4, kind: input, shape index: {}]   ;;  %s2322_s5 = inlined_call_operand.hbm [shape: bf16[256,128], index: 5, kind: input, shape index: {}]   ;;  %s2323_s6 = inlined_call_operand.vmem [shape: f32[1,128], index: 6, kind: input, shape index: {}]   ;;  %s2324_s7 = inlined_call_operand.hbm [shape: f32[8,128], index: 7, kind: output, shape index: {0}]   ;;  %s2325_s8 = inlined_call_operand.hbm [shape: f32[8,256], index: 8, kind: output, shape index: {1}]  }
   0x1   :  { %15 = vsyncpa [#allocation6], 0 }
   0x2   :  { %16 = vsyncpa [#allocation9], 0 }
   0x3   :  { %17 = vsyncpa [#allocation4], 0 }
   0x4   :  { %18 = vsyncpa [#allocation12], 0  ;;  %s2157_s27 = smov [#allocation5]   ;;  %s2015_s9 = scalar_lea.hbm %s2318_s1, 16384 }
   0x5   :  { %s34_s28 = sshll.u32 %s2157_s27, 4  ;;  %p2016_p0 = scmp.ne.s32.totalorder %s2318_s1, %s2015_s9  ;;  %s35_s28 = int_to_ptr.vmem [resolvable:$true] %s34_s28 }
   0x6   :  { %p2019_p1 = scmp.lt.u32.totalorder %s2015_s9, %s2318_s1 }
   0x8   :  { %p2021_p2 = pnand %p2019_p1, %p2016_p0 }
   0xa   :  { %2024 = shalt.err (!%p2021_p2)
}
   0xb   :  { %s2025_s14 = scalar_lea.vmem %s35_s28, 16384  ;;  %p2030_p4 = scmp.lt.s32.totalorder %s35_s28, %s35_s28 }
   0xc   :  { %p2026_p3 = scmp.ne.s32.totalorder %s35_s28, %s2025_s14  ;;  %p2031_p5 = scmp.lt.s32.totalorder %s2025_s14, %s2025_s14 }
   0xe   :  { %p2032_p6 = por %p2031_p5, %p2030_p4 }
  0x10   :  { %p2033_p7 = pnand %p2032_p6, %p2026_p3 }
  0x12   :  { %2036 = shalt.err (!%p2033_p7)
}
  0x13   :  { %s2158_s15 = smov 128   ;;  %s2159_s16 = smov 8  }
  0x14   :  { %40 = dma.hbm_to_vmem [thread:$0]  %s2318_s1, 16384, %s35_s28, [#allocation6], %s2158_s15, %s2158_s15, %s2159_s16  }
  0x15   :  { %s2160_s19 = smov [#allocation2]   ;;  %s2161_s21 = smov [#allocation7]  }
  0x16   :  { %s25_s20 = sshll.u32 %s2160_s19, 4  ;;  %s48_s22 = sshll.u32 %s2161_s21, 4  ;;  %s26_s20 = int_to_ptr.vmem [resolvable:$true] %s25_s20  ;;  %s49_s22 = int_to_ptr.vmem [resolvable:$true] %s48_s22 }
  0x17   :  { %s2037_s25 = scalar_lea.hbm %s2317_s0, 512 }
  0x18   :  { %p2038_p8 = scmp.ne.s32.totalorder %s2317_s0, %s2037_s25  ;;  %p2041_p9 = scmp.lt.u32.totalorder %s2037_s25, %s2317_s0 }
  0x1a   :  { %p2043_p10 = pnand %p2041_p9, %p2038_p8 }
  0x1c   :  { %2046 = shalt.err (!%p2043_p10)
}
  0x1d   :  { %s2047_s1 = scalar_lea.vmem %s26_s20, 512  ;;  %p2052_p12 = scmp.lt.s32.totalorder %s26_s20, %s26_s20 }
  0x1e   :  { %p2048_p11 = scmp.ne.s32.totalorder %s26_s20, %s2047_s1  ;;  %p2053_p13 = scmp.lt.s32.totalorder %s2047_s1, %s2047_s1 }
  0x20   :  { %p2054_p0 = por %p2053_p13, %p2052_p12 }
  0x22   :  { %p2055_p1 = pnand %p2054_p0, %p2048_p11 }
  0x24   :  { %2058 = shalt.err (!%p2055_p1)
}
  0x25   :  { %28 = dma.hbm_to_vmem [thread:$0]  %s2317_s0, 512, %s26_s20, [#allocation3]  }
  0x26   :  { %s2059_s12 = scalar_lea.hbm %s2320_s3, 4096 }
  0x27   :  { %p2060_p2 = scmp.ne.s32.totalorder %s2320_s3, %s2059_s12  ;;  %p2063_p3 = scmp.lt.u32.totalorder %s2059_s12, %s2320_s3 }
  0x29   :  { %p2065_p4 = pnand %p2063_p3, %p2060_p2 }
  0x2b   :  { %2068 = shalt.err (!%p2065_p4)
}
  0x2c   :  { %s2069_s19 = scalar_lea.vmem %s49_s22, 4096  ;;  %p2074_p6 = scmp.lt.s32.totalorder %s49_s22, %s49_s22 }
  0x2d   :  { %p2070_p5 = scmp.ne.s32.totalorder %s49_s22, %s2069_s19  ;;  %p2075_p7 = scmp.lt.s32.totalorder %s2069_s19, %s2069_s19 }
  0x2f   :  { %p2076_p8 = por %p2075_p7, %p2074_p6 }
  0x31   :  { %p2077_p9 = pnand %p2076_p8, %p2070_p5 }
  0x33   :  { %2080 = shalt.err (!%p2077_p9)
}
  0x34   :  { %54 = dma.hbm_to_vmem [thread:$0]  %s2320_s3, 4096, %s49_s22, [#allocation6], %s2158_s15, %s2158_s15, %s2159_s16  }
  0x35   :  { %s2162_s21 = smov [#allocation8]   ;;  %s2081_s26 = scalar_lea.hbm %s2322_s5, 2048 }
  0x36   :  { %s62_s23 = sshll.u32 %s2162_s21, 4  ;;  %p2082_p10 = scmp.ne.s32.totalorder %s2322_s5, %s2081_s26  ;;  %s63_s23 = int_to_ptr.vmem [resolvable:$true] %s62_s23 }
  0x37   :  { %p2085_p11 = scmp.lt.u32.totalorder %s2081_s26, %s2322_s5 }
  0x39   :  { %p2087_p12 = pnand %p2085_p11, %p2082_p10 }
  0x3b   :  { %2090 = shalt.err (!%p2087_p12)
}
  0x3c   :  { %s2091_s28 = scalar_lea.vmem %s63_s23, 2048  ;;  %p2096_p0 = scmp.lt.s32.totalorder %s63_s23, %s63_s23 }
  0x3d   :  { %p2092_p13 = scmp.ne.s32.totalorder %s63_s23, %s2091_s28  ;;  %p2097_p1 = scmp.lt.s32.totalorder %s2091_s28, %s2091_s28 }
  0x3f   :  { %p2098_p2 = por %p2097_p1, %p2096_p0 }
  0x41   :  { %p2099_p3 = pnand %p2098_p2, %p2092_p13 }
  0x43   :  { %2102 = shalt.err (!%p2099_p3)
}
  0x44   :  { %s2163_s3 = smov 64   ;;  %s2164_s15 = smov 4  }
  0x45   :  { %68 = dma.hbm_to_vmem [thread:$0]  %s2322_s5, 2048, %s63_s23, [#allocation9], %s2163_s3, %s2163_s3, %s2164_s15  }
  0x46   :  { %2147 = dma.done.wait [#allocation3], 512  }
  0x47   :  { %2148 = vsyncadd [#allocation3], 4294966784 }
  0x48   :  { %2149 = dma.done.wait [#allocation6], 20480  }
  0x49   :  { %2150 = vsyncadd [#allocation6], 4294946816 }
  0x4a   :  { %2151 = dma.done.wait [#allocation9], 2048  }
  0x4b   :  { %2152 = vsyncadd [#allocation9], 4294965248  ;;  %v1751_v0 = vld [vmem:[#allocation5 + $0x104] ss:$8 sps:$4 sm:$0xff]   ;;  %v1753_v1 = vld [vmem:[#allocation5 + $0x100] ss:$8 sps:$4 sm:$0xff]  }
  0x4c   :  { %937 = vmatprep.subr.bf16.mxu0 %v1751_v0  ;;  %v1754_v2 = vld [vmem:[#allocation5 + $0x114] ss:$8 sps:$4 sm:$0xff]   ;;  %v1756_v3 = vld [vmem:[#allocation5 + $0x110] ss:$8 sps:$4 sm:$0xff]   ;;  %v1757_v4 = vld [vmem:[#allocation5 + $0x124] ss:$8 sps:$4 sm:$0xff]  }
  0x4d   :  { %938 = vmatpush1.bf16.msra.mxu0 %v1753_v1  ;;  %v1759_v5 = vld [vmem:[#allocation5 + $0x120] ss:$8 sps:$4 sm:$0xff]   ;;  %v1760_v6 = vld [vmem:[#allocation5 + $0x134] ss:$8 sps:$4 sm:$0xff]   ;;  %v1762_v7 = vld [vmem:[#allocation5 + $0x130] ss:$8 sps:$4 sm:$0xff]  }
  0x4e   :  { %939 = vmatprep.subr.bf16.mxu0 %v1754_v2  ;;  %v1763_v8 = vld [vmem:[#allocation5 + $0x144] ss:$8 sps:$4 sm:$0xff]   ;;  %v1765_v9 = vld [vmem:[#allocation5 + $0x140] ss:$8 sps:$4 sm:$0xff]   ;;  %v1766_v10 = vld [vmem:[#allocation5 + $0x154] ss:$8 sps:$4 sm:$0xff]  }
  0x4f   :  { %v1768_v11 = vld [vmem:[#allocation5 + $0x150] ss:$8 sps:$4 sm:$0xff]   ;;  %v1769_v12 = vld [vmem:[#allocation5 + $0x164] ss:$8 sps:$4 sm:$0xff]   ;;  %v1771_v15 = vld [vmem:[#allocation5 + $0x160] ss:$8 sps:$4 sm:$0xff]  }
  0x50   :  { %v2266_v13 = vld [vmem:[#allocation2 + $0x8] sm:$0xff]  ;;  %v1772_v16 = vld [vmem:[#allocation5 + $0x174] ss:$8 sps:$4 sm:$0xff]   ;;  %v1774_v17 = vld [vmem:[#allocation5 + $0x170] ss:$8 sps:$4 sm:$0xff]   ;;  %s2165_s11 = smov [#allocation11]  }
  0x51   :  { %940 = vmatpush1.bf16.msra.mxu0 %v1756_v3  ;;  %v1525_v14 = vcombine.high %v2266_v13, %v2266_v13  ;;  %v1775_v18 = vld [vmem:[#allocation5 + $0x184] ss:$8 sps:$4 sm:$0xff]   ;;  %v1777_v19 = vld [vmem:[#allocation5 + $0x180] ss:$8 sps:$4 sm:$0xff]   ;;  %v1778_v20 = vld [vmem:[#allocation5 + $0x194] ss:$8 sps:$4 sm:$0xff]   ;;  %v1524_v48 = vcombine.low %v2266_v13, %v2266_v13 }
  0x52   :  { %941 = vmatprep.subr.bf16.mxu0 %v1757_v4  ;;  %v1780_v21 = vld [vmem:[#allocation5 + $0x190] ss:$8 sps:$4 sm:$0xff]   ;;  %v1781_v22 = vld [vmem:[#allocation5 + $0x1a4] ss:$8 sps:$4 sm:$0xff]   ;;  %v1783_v23 = vld [vmem:[#allocation5 + $0x1a0] ss:$8 sps:$4 sm:$0xff]  }
  0x53   :  { %969 = vmatprep.mubr.bf16.mxu0 %v1525_v14  ;;  %v1784_v24 = vld [vmem:[#allocation5 + $0x1b4] ss:$8 sps:$4 sm:$0xff]   ;;  %v1846_v25 = vld [vmem:[#allocation5 + $0x4] ss:$8 sps:$4 sm:$0xff]   ;;  %v1848_v26 = vld [vmem:[#allocation5] ss:$8 sps:$4 sm:$0xff]  }
  0x54   :  { %v1786_v27 = vld [vmem:[#allocation5 + $0x1b0] ss:$8 sps:$4 sm:$0xff]   ;;  %v1787_v28 = vld [vmem:[#allocation5 + $0x1c4] ss:$8 sps:$4 sm:$0xff]   ;;  %896 = vmatprep.subr.bf16.mxu1 %v1846_v25  ;;  %v1852_v29 = vld [vmem:[#allocation5 + $0x14] ss:$8 sps:$4 sm:$0xff]  }
  0x55   :  { %942 = vmatpush1.bf16.msra.mxu0 %v1759_v5  ;;  %897 = vmatpush1.bf16.msra.mxu1 %v1848_v26  ;;  %v1854_v30 = vld [vmem:[#allocation5 + $0x10] ss:$8 sps:$4 sm:$0xff]   ;;  %v1789_v31 = vld [vmem:[#allocation5 + $0x1c0] ss:$8 sps:$4 sm:$0xff]   ;;  %v1790_v32 = vld [vmem:[#allocation5 + $0x1d4] ss:$8 sps:$4 sm:$0xff]  }
  0x56   :  { %943 = vmatprep.subr.bf16.mxu0 %v1760_v6  ;;  %898 = vmatprep.subr.bf16.mxu1 %v1852_v29  ;;  %v1860_v33 = vld [vmem:[#allocation5 + $0x24] ss:$8 sps:$4 sm:$0xff]   ;;  %v1862_v34 = vld [vmem:[#allocation5 + $0x20] ss:$8 sps:$4 sm:$0xff]   ;;  %v1866_v35 = vld [vmem:[#allocation5 + $0x34] ss:$8 sps:$4 sm:$0xff]  }
  0x57   :  { %v1792_v36 = vld [vmem:[#allocation5 + $0x1d0] ss:$8 sps:$4 sm:$0xff]   ;;  %v1793_v37 = vld [vmem:[#allocation5 + $0x1e4] ss:$8 sps:$4 sm:$0xff]   ;;  %v1795_v40 = vld [vmem:[#allocation5 + $0x1e0] ss:$8 sps:$4 sm:$0xff]  }
  0x58   :  { %v1868_v38 = vld [vmem:[#allocation5 + $0x30] ss:$8 sps:$4 sm:$0xff]   ;;  %v1872_v39 = vld [vmem:[#allocation5 + $0x44] ss:$8 sps:$4 sm:$0xff]   ;;  %v1796_v41 = vld [vmem:[#allocation5 + $0x1f4] ss:$8 sps:$4 sm:$0xff]  }
  0x59   :  { %944 = vmatpush1.bf16.msra.mxu0 %v1762_v7  ;;  %899 = vmatpush1.bf16.msra.mxu1 %v1854_v30  ;;  %v1874_v42 = vld [vmem:[#allocation5 + $0x40] ss:$8 sps:$4 sm:$0xff]   ;;  %v1878_v43 = vld [vmem:[#allocation5 + $0x54] ss:$8 sps:$4 sm:$0xff]   ;;  %v1798_v44 = vld [vmem:[#allocation5 + $0x1f0] ss:$8 sps:$4 sm:$0xff]  }
  0x5a   :  { %945 = vmatprep.subr.bf16.mxu0 %v1763_v8  ;;  %900 = vmatprep.subr.bf16.mxu1 %v1860_v33  ;;  %v1803_v45 = vld [vmem:[#allocation5 + $0x204] ss:$8 sps:$4 sm:$0xff]   ;;  %v2270_v46 = vld [vmem:[#allocation2 + $0x10] sm:$0xff]  ;;  %v1801_v50 = vld [vmem:[#allocation5 + $0x200] ss:$8 sps:$4 sm:$0xff]   ;;  %s1507_s12 = sshll.u32 %s2165_s11, 4  ;;  %s1508_s12 = int_to_ptr.vmem [resolvable:$true] %s1507_s12 }
  0x5b   :  { %v1880_v47 = vld [vmem:[#allocation5 + $0x50] ss:$8 sps:$4 sm:$0xff]   ;;  %v1884_v49 = vld [vmem:[#allocation5 + $0x64] ss:$8 sps:$4 sm:$0xff]   ;;  %v1527_v51 = vcombine.high %v2270_v46, %v2270_v46  ;;  %v1806_v52 = vld [vmem:[#allocation5 + $0x214] ss:$8 sps:$4 sm:$0xff]   ;;  %p2108_p5 = scmp.lt.s32.totalorder %s1508_s12, %s1508_s12 }
  0x5c   :  { %v1886_v53 = vld [vmem:[#allocation5 + $0x60] ss:$8 sps:$4 sm:$0xff]   ;;  %v1890_v54 = vld [vmem:[#allocation5 + $0x74] ss:$8 sps:$4 sm:$0xff]   ;;  %v1804_v55 = vld [vmem:[#allocation5 + $0x210] ss:$8 sps:$4 sm:$0xff]  }
  0x5d   :  { %946 = vmatpush1.bf16.msra.mxu0 %v1765_v9  ;;  %901 = vmatpush1.bf16.msra.mxu1 %v1862_v34  ;;  %v1809_v56 = vld [vmem:[#allocation5 + $0x224] ss:$8 sps:$4 sm:$0xff]   ;;  %v1892_v57 = vld [vmem:[#allocation5 + $0x70] ss:$8 sps:$4 sm:$0xff]   ;;  %v1807_v59 = vld [vmem:[#allocation5 + $0x220] ss:$8 sps:$4 sm:$0xff]  }
  0x5e   :  { %947 = vmatprep.subr.bf16.mxu0 %v1766_v10  ;;  %902 = vmatprep.subr.bf16.mxu1 %v1866_v35  ;;  %v1896_v58 = vld [vmem:[#allocation5 + $0x84] ss:$8 sps:$4 sm:$0xff]   ;;  %v1812_v60 = vld [vmem:[#allocation5 + $0x234] ss:$8 sps:$4 sm:$0xff]   ;;  %v1898_v61 = vld [vmem:[#allocation5 + $0x80] ss:$8 sps:$4 sm:$0xff]  }
  0x5f   :  { %v1902_v62 = vld [vmem:[#allocation5 + $0x94] ss:$8 sps:$4 sm:$0xff]   ;;  %v1810_v63 = vld [vmem:[#allocation5 + $0x230] ss:$8 sps:$4 sm:$0xff]   ;;  %v1815_v0 = vld [vmem:[#allocation5 + $0x244] ss:$8 sps:$4 sm:$0xff]  }
  0x60   :  { %v1904_v1 = vld [vmem:[#allocation5 + $0x90] ss:$8 sps:$4 sm:$0xff]   ;;  %v1908_v2 = vld [vmem:[#allocation5 + $0xa4] ss:$8 sps:$4 sm:$0xff]   ;;  %v1813_v3 = vld [vmem:[#allocation5 + $0x240] ss:$8 sps:$4 sm:$0xff]  }
  0x61   :  { %948 = vmatpush1.bf16.msra.mxu0 %v1768_v11  ;;  %903 = vmatpush1.bf16.msra.mxu1 %v1868_v38  ;;  %v1818_v4 = vld [vmem:[#allocation5 + $0x254] ss:$8 sps:$4 sm:$0xff]   ;;  %v1910_v5 = vld [vmem:[#allocation5 + $0xa0] ss:$8 sps:$4 sm:$0xff]   ;;  %v1816_v7 = vld [vmem:[#allocation5 + $0x250] ss:$8 sps:$4 sm:$0xff]  }
  0x62   :  { %949 = vmatprep.subr.bf16.mxu0 %v1769_v12  ;;  %904 = vmatprep.subr.bf16.mxu1 %v1872_v39  ;;  %v1914_v6 = vld [vmem:[#allocation5 + $0xb4] ss:$8 sps:$4 sm:$0xff]   ;;  %v1821_v8 = vld [vmem:[#allocation5 + $0x264] ss:$8 sps:$4 sm:$0xff]   ;;  %v1916_v10 = vld [vmem:[#allocation5 + $0xb0] ss:$8 sps:$4 sm:$0xff]  }
  0x63   :  { %v84_v9 = vld [vmem:[#allocation2] sm:$0xff]  ;;  %v1824_v14 = vld [vmem:[#allocation5 + $0x274] ss:$8 sps:$4 sm:$0xff]   ;;  %v1828_v25 = vld [vmem:[#allocation5 + $0x290] ss:$8 sps:$4 sm:$0xff]  }
  0x64   :  { %v1523_v11 = vcombine.high %v84_v9, %v84_v9  ;;  %v1920_v12 = vld [vmem:[#allocation5 + $0xc4] ss:$8 sps:$4 sm:$0xff]   ;;  %v1819_v13 = vld [vmem:[#allocation5 + $0x260] ss:$8 sps:$4 sm:$0xff]   ;;  %v1836_v30 = vld [vmem:[#allocation5 + $0x2b4] ss:$8 sps:$4 sm:$0xff]  }
  0x65   :  { %950 = vmatpush1.bf16.msra.mxu0 %v1771_v15  ;;  %905 = vmatpush1.bf16.msra.mxu1 %v1874_v42  ;;  %v1922_v15 = vld [vmem:[#allocation5 + $0xc0] ss:$8 sps:$4 sm:$0xff]   ;;  %v1833_v26 = vld [vmem:[#allocation5 + $0x2a4] ss:$8 sps:$4 sm:$0xff]   ;;  %v1956_v33 = vld [vmem:[#allocation7 + $0x14] ss:$8 sps:$4 sm:$0xff]  }
  0x66   :  { %951 = vmatprep.subr.bf16.mxu0 %v1772_v16  ;;  %906 = vmatprep.subr.bf16.mxu1 %v1878_v43  ;;  %v1926_v16 = vld [vmem:[#allocation5 + $0xd4] ss:$8 sps:$4 sm:$0xff]   ;;  %v1953_v29 = vld [vmem:[#allocation7 + $0x4] ss:$8 sps:$4 sm:$0xff]   ;;  %v1834_v34 = vld [vmem:[#allocation5 + $0x2b0] ss:$8 sps:$4 sm:$0xff]  }
  0x67   :  { %928 = vmatprep.mubr.bf16.mxu1 %v1523_v11  ;;  %v1839_v35 = vld [vmem:[#allocation5 + $0x2c4] ss:$8 sps:$4 sm:$0xff]   ;;  %v1837_v38 = vld [vmem:[#allocation5 + $0x2c0] ss:$8 sps:$4 sm:$0xff]   ;;  %v1842_v39 = vld [vmem:[#allocation5 + $0x2d4] ss:$8 sps:$4 sm:$0xff]  }
  0x68   :  { %v1840_v42 = vld [vmem:[#allocation5 + $0x2d0] ss:$8 sps:$4 sm:$0xff]   ;;  %v1845_v43 = vld [vmem:[#allocation5 + $0x2e4] ss:$8 sps:$4 sm:$0xff]   ;;  %v1981_v11 = vld [vmem:[#allocation7 + $0xa0] ss:$8 sps:$4 sm:$0xff]  }
  0x69   :  { %952 = vmatpush1.bf16.msra.mxu0 %v1774_v17  ;;  %907 = vmatpush1.bf16.msra.mxu1 %v1880_v47  ;;  %v1822_v17 = vld [vmem:[#allocation5 + $0x270] ss:$8 sps:$4 sm:$0xff]   ;;  %v1843_v47 = vld [vmem:[#allocation5 + $0x2e0] ss:$8 sps:$4 sm:$0xff]  }
  0x6a   :  { %953 = vmatprep.subr.bf16.mxu0 %v1775_v18  ;;  %908 = vmatprep.subr.bf16.mxu1 %v1884_v49  ;;  %v1827_v18 = vld [vmem:[#allocation5 + $0x284] ss:$8 sps:$4 sm:$0xff]   ;;  %v1963_v49 = vld [vmem:[#allocation7 + $0x40] ss:$8 sps:$4 sm:$0xff]  }
  0x6d   :  { %954 = vmatpush1.bf16.msra.mxu0 %v1777_v19  ;;  %909 = vmatpush1.bf16.msra.mxu1 %v1886_v53  ;;  %v1928_v19 = vld [vmem:[#allocation5 + $0xd0] ss:$8 sps:$4 sm:$0xff]  }
  0x6e   :  { %955 = vmatprep.subr.bf16.mxu0 %v1778_v20  ;;  %910 = vmatprep.subr.bf16.mxu1 %v1890_v54  ;;  %v1932_v20 = vld [vmem:[#allocation5 + $0xe4] ss:$8 sps:$4 sm:$0xff]   ;;  %v2276_v53 = vld [vmem:[#allocation2 + $0x18] sm:$0xff] }
  0x6f   :  { %v1966_v54 = vld [vmem:[#allocation7 + $0x50] ss:$8 sps:$4 sm:$0xff]  }
  0x71   :  { %956 = vmatpush1.bf16.msra.mxu0 %v1780_v21  ;;  %911 = vmatpush1.bf16.msra.mxu1 %v1892_v57  ;;  %v1825_v21 = vld [vmem:[#allocation5 + $0x280] ss:$8 sps:$4 sm:$0xff]  }
  0x72   :  { %957 = vmatprep.subr.bf16.mxu0 %v1781_v22  ;;  %912 = vmatprep.subr.bf16.mxu1 %v1896_v58  ;;  %v1830_v22 = vld [vmem:[#allocation5 + $0x294] ss:$8 sps:$4 sm:$0xff]   ;;  %v1857_v57 = vld [vmem:[#allocation5 + $0x300] ss:$8 sps:$4 sm:$0xff]   ;;  %v1529_v58 = vcombine.high %v2276_v53, %v2276_v53 }
  0x75   :  { %958 = vmatpush1.bf16.msra.mxu0 %v1783_v23  ;;  %913 = vmatpush1.bf16.msra.mxu1 %v1898_v61  ;;  %v1934_v23 = vld [vmem:[#allocation5 + $0xe0] ss:$8 sps:$4 sm:$0xff]   ;;  %v1974_v61 = vld [vmem:[#allocation7 + $0x74] ss:$8 sps:$4 sm:$0xff]  }
  0x76   :  { %959 = vmatprep.subr.bf16.mxu0 %v1784_v24  ;;  %914 = vmatprep.subr.bf16.mxu1 %v1902_v62  ;;  %v1938_v24 = vld [vmem:[#allocation5 + $0xf4] ss:$8 sps:$4 sm:$0xff]   ;;  %v1863_v62 = vld [vmem:[#allocation5 + $0x310] ss:$8 sps:$4 sm:$0xff]  }
  0x79   :  { %960 = vmatpush1.bf16.msra.mxu0 %v1786_v27  ;;  %915 = vmatpush1.bf16.msra.mxu1 %v1904_v1  ;;  %v1940_v27 = vld [vmem:[#allocation5 + $0xf0] ss:$8 sps:$4 sm:$0xff]   ;;  %v1869_v1 = vld [vmem:[#allocation5 + $0x320] ss:$8 sps:$4 sm:$0xff]  }
  0x7a   :  { %961 = vmatprep.subr.bf16.mxu0 %v1787_v28  ;;  %916 = vmatprep.subr.bf16.mxu1 %v1908_v2  ;;  %v1831_v28 = vld [vmem:[#allocation5 + $0x2a0] ss:$8 sps:$4 sm:$0xff]   ;;  %v1877_v2 = vld [vmem:[#allocation5 + $0x334] ss:$8 sps:$4 sm:$0xff]  }
  0x7d   :  { %962 = vmatpush1.bf16.msra.mxu0 %v1789_v31  ;;  %917 = vmatpush1.bf16.msra.mxu1 %v1910_v5  ;;  %v1951_v31 = vld [vmem:[#allocation7] ss:$8 sps:$4 sm:$0xff]   ;;  %v1875_v5 = vld [vmem:[#allocation5 + $0x330] ss:$8 sps:$4 sm:$0xff]  }
  0x7e   :  { %963 = vmatprep.subr.bf16.mxu0 %v1790_v32  ;;  %918 = vmatprep.subr.bf16.mxu1 %v1914_v6  ;;  %v1522_v32 = vcombine.low %v84_v9, %v84_v9  ;;  %v1883_v6 = vld [vmem:[#allocation5 + $0x344] ss:$8 sps:$4 sm:$0xff]   ;;  %v1881_v9 = vld [vmem:[#allocation5 + $0x340] ss:$8 sps:$4 sm:$0xff]  }
  0x81   :  { %964 = vmatpush1.bf16.msra.mxu0 %v1792_v36  ;;  %919 = vmatpush1.bf16.msra.mxu1 %v1916_v10  ;;  %v1954_v36 = vld [vmem:[#allocation7 + $0x10] ss:$8 sps:$4 sm:$0xff]   ;;  %v1889_v10 = vld [vmem:[#allocation5 + $0x354] ss:$8 sps:$4 sm:$0xff]  }
  0x82   :  { %965 = vmatprep.subr.bf16.mxu0 %v1793_v37  ;;  %920 = vmatprep.subr.bf16.mxu1 %v1920_v12  ;;  %v1959_v37 = vld [vmem:[#allocation7 + $0x24] ss:$8 sps:$4 sm:$0xff]   ;;  %v1986_v12 = vld [vmem:[#allocation7 + $0xb4] ss:$8 sps:$4 sm:$0xff]  }
  0x85   :  { %966 = vmatpush1.bf16.msra.mxu0 %v1795_v40  ;;  %921 = vmatpush1.bf16.msra.mxu1 %v1922_v15  ;;  %v1957_v40 = vld [vmem:[#allocation7 + $0x20] ss:$8 sps:$4 sm:$0xff]   ;;  %v1984_v15 = vld [vmem:[#allocation7 + $0xb0] ss:$8 sps:$4 sm:$0xff]  }
  0x86   :  { %967 = vmatprep.subr.bf16.mxu0 %v1796_v41  ;;  %922 = vmatprep.subr.bf16.mxu1 %v1926_v16  ;;  %v1962_v41 = vld [vmem:[#allocation7 + $0x34] ss:$8 sps:$4 sm:$0xff]   ;;  %v1989_v16 = vld [vmem:[#allocation7 + $0xc4] ss:$8 sps:$4 sm:$0xff]  }
  0x89   :  { %968 = vmatpush1.bf16.msra.mxu0 %v1798_v44  ;;  %923 = vmatpush1.bf16.msra.mxu1 %v1928_v19  ;;  %v1960_v44 = vld [vmem:[#allocation7 + $0x30] ss:$8 sps:$4 sm:$0xff]   ;;  %v1987_v19 = vld [vmem:[#allocation7 + $0xc0] ss:$8 sps:$4 sm:$0xff]  }
  0x8a   :  { %978 = vmatprep.subr.bf16.mxu0 %v1803_v45  ;;  %924 = vmatprep.subr.bf16.mxu1 %v1932_v20  ;;  %v1965_v45 = vld [vmem:[#allocation7 + $0x44] ss:$8 sps:$4 sm:$0xff]   ;;  %v1899_v20 = vld [vmem:[#allocation5 + $0x370] ss:$8 sps:$4 sm:$0xff]  }
  0x8c   :  { %970 = vmatmul.mubr.bf16.vlgmr.msra.gmra.mrb[0].mxu0 %v1524_v48  ;;  %v1851_v48 = vld [vmem:[#allocation5 + $0x2f4] ss:$8 sps:$4 sm:$0xff]  }
  0x8d   :  { %979 = vmatpush1.bf16.msra.mxu0 %v1801_v50  ;;  %1010 = vmatprep.mubr.bf16.mxu0 %v1527_v51  ;;  %v1968_v50 = vld [vmem:[#allocation7 + $0x54] ss:$8 sps:$4 sm:$0xff]   ;;  %v1849_v51 = vld [vmem:[#allocation5 + $0x2f0] ss:$8 sps:$4 sm:$0xff]  }
  0x8e   :  { %980 = vmatprep.subr.bf16.mxu0 %v1806_v52  ;;  %925 = vmatpush1.bf16.msra.mxu1 %v1934_v23  ;;  %v1859_v52 = vld [vmem:[#allocation5 + $0x304] ss:$8 sps:$4 sm:$0xff]   ;;  %v1913_v23 = vld [vmem:[#allocation5 + $0x394] ss:$8 sps:$4 sm:$0xff]  }
  0x8f   :  { %926 = vmatprep.subr.bf16.mxu1 %v1938_v24  ;;  %v1911_v24 = vld [vmem:[#allocation5 + $0x390] ss:$8 sps:$4 sm:$0xff]  }
  0x91   :  { %981 = vmatpush1.bf16.msra.mxu0 %v1804_v55  ;;  %v1526_v55 = vcombine.low %v2270_v46, %v2270_v46  ;;  %v1972_v46 = vld [vmem:[#allocation7 + $0x70] ss:$8 sps:$4 sm:$0xff]  }
  0x92   :  { %982 = vmatprep.subr.bf16.mxu0 %v1809_v56  ;;  %927 = vmatpush1.bf16.msra.mxu1 %v1940_v27  ;;  %v1971_v56 = vld [vmem:[#allocation7 + $0x64] ss:$8 sps:$4 sm:$0xff]   ;;  %v1925_v27 = vld [vmem:[#allocation5 + $0x3b4] ss:$8 sps:$4 sm:$0xff]  }
  0x93   :  { %1268 = vmatprep.subr.bf16.mxu1 %v1953_v29  ;;  %v1931_v29 = vld [vmem:[#allocation5 + $0x3c4] ss:$8 sps:$4 sm:$0xff]  }
  0x95   :  { %983 = vmatpush1.bf16.msra.mxu0 %v1807_v59  ;;  %929 = vmatmul.mubr.bf16.vlgmr.msra.gmra.mrb[0].mxu1 %v1522_v32  ;;  %v1865_v59 = vld [vmem:[#allocation5 + $0x314] ss:$8 sps:$4 sm:$0xff]   ;;  %v1935_v32 = vld [vmem:[#allocation5 + $0x3d0] ss:$8 sps:$4 sm:$0xff]  }
  0x96   :  { %984 = vmatprep.subr.bf16.mxu0 %v1812_v60  ;;  %1269 = vmatpush1.bf16.msra.mxu1 %v1951_v31  ;;  %v1969_v60 = vld [vmem:[#allocation7 + $0x60] ss:$8 sps:$4 sm:$0xff]   ;;  %v1937_v31 = vld [vmem:[#allocation5 + $0x3d4] ss:$8 sps:$4 sm:$0xff]  }
  0x97   :  { %1270 = vmatprep.subr.bf16.mxu1 %v1956_v33  ;;  %v1943_v33 = vld [vmem:[#allocation5 + $0x3e4] ss:$8 sps:$4 sm:$0xff]  }
  0x99   :  { %985 = vmatpush1.bf16.msra.mxu0 %v1810_v63  ;;  %v1871_v63 = vld [vmem:[#allocation5 + $0x324] ss:$8 sps:$4 sm:$0xff]  }
  0x9a   :  { %986 = vmatprep.subr.bf16.mxu0 %v1815_v0  ;;  %1271 = vmatpush1.bf16.msra.mxu1 %v1954_v36  ;;  %v1977_v0 = vld [vmem:[#allocation7 + $0x84] ss:$8 sps:$4 sm:$0xff]   ;;  %v1946_v36 = vld [vmem:[#allocation5 + $0x3f0] ss:$8 sps:$4 sm:$0xff]  }
  0x9b   :  { %1272 = vmatprep.subr.bf16.mxu1 %v1959_v37  ;;  %v1528_v37 = vcombine.low %v2276_v53, %v2276_v53  ;;  %v216_v53 = vld [vmem:[%s2319_s2] sm:$0x3] }
  0x9d   :  { %987 = vmatpush1.bf16.msra.mxu0 %v1813_v3  ;;  %v1975_v3 = vld [vmem:[#allocation7 + $0x80] ss:$8 sps:$4 sm:$0xff]  }
  0x9e   :  { %988 = vmatprep.subr.bf16.mxu0 %v1818_v4  ;;  %1273 = vmatpush1.bf16.msra.mxu1 %v1957_v40  ;;  %v1980_v4 = vld [vmem:[#allocation7 + $0x94] ss:$8 sps:$4 sm:$0xff]   ;;  %v1995_v40 = vld [vmem:[#allocation7 + $0xe4] ss:$8 sps:$4 sm:$0xff]  }
  0x9f   :  { %1274 = vmatprep.subr.bf16.mxu1 %v1962_v41  ;;  %v1993_v41 = vld [vmem:[#allocation7 + $0xe0] ss:$8 sps:$4 sm:$0xff]  }
  0xa1   :  { %989 = vmatpush1.bf16.msra.mxu0 %v1816_v7  ;;  %v1978_v7 = vld [vmem:[#allocation7 + $0x90] ss:$8 sps:$4 sm:$0xff]  }
  0xa2   :  { %990 = vmatprep.subr.bf16.mxu0 %v1821_v8  ;;  %1275 = vmatpush1.bf16.msra.mxu1 %v1960_v44  ;;  %v1983_v8 = vld [vmem:[#allocation7 + $0xa4] ss:$8 sps:$4 sm:$0xff]  }
  0xa3   :  { %1276 = vmatprep.subr.bf16.mxu1 %v1965_v45  ;;  %v1999_v44 = vld [vmem:[#allocation8 + $0x40] sm:$0xff]  }
  0xa5   :  { %991 = vmatpush1.bf16.msra.mxu0 %v1819_v13  ;;  %v1887_v13 = vld [vmem:[#allocation5 + $0x350] ss:$8 sps:$4 sm:$0xff]  }
  0xa6   :  { %992 = vmatprep.subr.bf16.mxu0 %v1824_v14  ;;  %1277 = vmatpush1.bf16.msra.mxu1 %v1963_v49  ;;  %v1895_v14 = vld [vmem:[#allocation5 + $0x364] ss:$8 sps:$4 sm:$0xff]  }
  0xa7   :  { %1278 = vmatprep.subr.bf16.mxu1 %v1968_v50  ;;  %v218_v50 = vlaneseq }
  0xa9   :  { %993 = vmatpush1.bf16.msra.mxu0 %v1822_v17  ;;  %v1893_v17 = vld [vmem:[#allocation5 + $0x360] ss:$8 sps:$4 sm:$0xff]  }
  0xaa   :  { %994 = vmatprep.subr.bf16.mxu0 %v1827_v18  ;;  %1279 = vmatpush1.bf16.msra.mxu1 %v1966_v54  ;;  %v1901_v18 = vld [vmem:[#allocation5 + $0x374] ss:$8 sps:$4 sm:$0xff]  }
  0xab   :  { %1280 = vmatprep.subr.bf16.mxu1 %v1971_v56 }
  0xad   :  { %995 = vmatpush1.bf16.msra.mxu0 %v1825_v21  ;;  %v1907_v21 = vld [vmem:[#allocation5 + $0x384] ss:$8 sps:$4 sm:$0xff]  }
  0xae   :  { %996 = vmatprep.subr.bf16.mxu0 %v1830_v22  ;;  %1281 = vmatpush1.bf16.msra.mxu1 %v1969_v60  ;;  %v1905_v22 = vld [vmem:[#allocation5 + $0x380] ss:$8 sps:$4 sm:$0xff]  }
  0xaf   :  { %1282 = vmatprep.subr.bf16.mxu1 %v1974_v61 }
  0xb1   :  { %997 = vmatpush1.bf16.msra.mxu0 %v1828_v25  ;;  %v1919_v25 = vld [vmem:[#allocation5 + $0x3a4] ss:$8 sps:$4 sm:$0xff]  }
  0xb2   :  { %998 = vmatprep.subr.bf16.mxu0 %v1833_v26  ;;  %1283 = vmatpush1.bf16.msra.mxu1 %v1972_v46  ;;  %v1917_v26 = vld [vmem:[#allocation5 + $0x3a0] ss:$8 sps:$4 sm:$0xff]  }
  0xb3   :  { %1284 = vmatprep.subr.bf16.mxu1 %v1977_v0 }
  0xb5   :  { %999 = vmatpush1.bf16.msra.mxu0 %v1831_v28  ;;  %v1923_v28 = vld [vmem:[#allocation5 + $0x3b0] ss:$8 sps:$4 sm:$0xff]  }
  0xb6   :  { %1000 = vmatprep.subr.bf16.mxu0 %v1836_v30  ;;  %1285 = vmatpush1.bf16.msra.mxu1 %v1975_v3  ;;  %v1929_v30 = vld [vmem:[#allocation5 + $0x3c0] ss:$8 sps:$4 sm:$0xff]  }
  0xb7   :  { %1286 = vmatprep.subr.bf16.mxu1 %v1980_v4  ;;  %v2000_v3 = vld [vmem:[#allocation8] sm:$0xff]  }
  0xb9   :  { %1001 = vmatpush1.bf16.msra.mxu0 %v1834_v34  ;;  %v1941_v34 = vld [vmem:[#allocation5 + $0x3e0] ss:$8 sps:$4 sm:$0xff]  }
  0xba   :  { %1002 = vmatprep.subr.bf16.mxu0 %v1839_v35  ;;  %1287 = vmatpush1.bf16.msra.mxu1 %v1978_v7  ;;  %v1948_v35 = vld [vmem:[#allocation5 + $0x3f4] ss:$8 sps:$4 sm:$0xff]  }
  0xbb   :  { %1288 = vmatprep.subr.bf16.mxu1 %v1983_v8  ;;  %v2003_v7 = vld [vmem:[#allocation8 + $0x50] sm:$0xff]  }
  0xbc   :  { %v2004_v8 = vld [vmem:[#allocation8 + $0x10] sm:$0xff]  }
  0xbd   :  { %1003 = vmatpush1.bf16.msra.mxu0 %v1837_v38  ;;  %v1990_v38 = vld [vmem:[#allocation7 + $0xd0] ss:$8 sps:$4 sm:$0xff]  }
  0xbe   :  { %1004 = vmatprep.subr.bf16.mxu0 %v1842_v39  ;;  %1289 = vmatpush1.bf16.msra.mxu1 %v1981_v11  ;;  %v1992_v39 = vld [vmem:[#allocation7 + $0xd4] ss:$8 sps:$4 sm:$0xff]   ;;  %v2007_v11 = vld [vmem:[#allocation8 + $0x60] sm:$0xff]  }
  0xbf   :  { %1290 = vmatprep.subr.bf16.mxu1 %v1986_v12  ;;  %v2008_v12 = vld [vmem:[#allocation8 + $0x20] sm:$0xff]  }
  0xc1   :  { %1005 = vmatpush1.bf16.msra.mxu0 %v1840_v42  ;;  %v1998_v42 = vld [vmem:[#allocation7 + $0xf4] ss:$8 sps:$4 sm:$0xff]  }
  0xc2   :  { %1006 = vmatprep.subr.bf16.mxu0 %v1845_v43  ;;  %1291 = vmatpush1.bf16.msra.mxu1 %v1984_v15  ;;  %v1996_v43 = vld [vmem:[#allocation7 + $0xf0] ss:$8 sps:$4 sm:$0xff]  }
  0xc3   :  { %1292 = vmatprep.subr.bf16.mxu1 %v1989_v16  ;;  %v2011_v15 = vld [vmem:[#allocation8 + $0x70] sm:$0xff]  }
  0xc4   :  { %v2012_v16 = vld [vmem:[#allocation8 + $0x30] sm:$0xff]  }
  0xc5   :  { %1007 = vmatpush1.bf16.msra.mxu0 %v1843_v47 }
  0xc6   :  { %1008 = vmatprep.subr.bf16.mxu0 %v1851_v48  ;;  %1293 = vmatpush1.bf16.msra.mxu1 %v1987_v19  ;;  %v1096_v19 = vld [vmem:[%s2321_s4] sm:$0x3]  ;;  %s2103_s4 = scalar_lea.vmem %s1508_s12, 256 }
  0xc7   :  { %1294 = vmatprep.subr.bf16.mxu1 %v1992_v39  ;;  %p2104_p4 = scmp.ne.s32.totalorder %s1508_s12, %s2103_s4  ;;  %p2109_p6 = scmp.lt.s32.totalorder %s2103_s4, %s2103_s4 }
  0xc9   :  { %1009 = vmatpush1.bf16.msra.mxu0 %v1849_v51  ;;  %v219_v51 = vshrl.u32 %v218_v50, 7  ;;  %p2110_p7 = por %p2109_p6, %p2108_p5 }
  0xca   :  { %1019 = vmatprep.subr.bf16.mxu0 %v1859_v52  ;;  %1295 = vmatpush1.bf16.msra.mxu1 %v1990_v38 }
  0xcb   :  { %1296 = vmatprep.subr.bf16.mxu1 %v1995_v40  ;;  %v220_v52 = vsub.s32 0, %v219_v51  ;;  %v224_v54 = vsub.s32 1, %v219_v51  ;;  %p2111_p8 = pnand %p2110_p7, %p2104_p4 }
  0xcc   :  { %1011 = vmatmul.mubr.bf16.vlgmr.msra.gmra.mrb[0].mxu0 %v1526_v55 }
  0xcd   :  { %1020 = vmatpush1.bf16.msra.mxu0 %v1857_v57  ;;  %1051 = vmatprep.mubr.bf16.mxu0 %v1529_v58  ;;  %v221_v55 = vrot.slane %v216_v53, %v220_v52  ;;  %v225_v56 = vrot.slane %v216_v53, %v224_v54 }
  0xce   :  { %1021 = vmatprep.subr.bf16.mxu0 %v1865_v59  ;;  %1297 = vmatpush1.bf16.msra.mxu1 %v1993_v41 }
  0xcf   :  { %1298 = vmatprep.subr.bf16.mxu1 %v1998_v42 }
  0xd1   :  { %1022 = vmatpush1.bf16.msra.mxu0 %v1863_v62 }
  0xd2   :  { %1023 = vmatprep.subr.bf16.mxu0 %v1871_v63  ;;  %1299 = vmatpush1.bf16.msra.mxu1 %v1996_v43 }
  0xd3   :  { %1707 = vmatprep.subr.bf16.mxu1 %v1999_v44 }
  0xd5   :  { %1024 = vmatpush1.bf16.msra.mxu0 %v1869_v1 }
  0xd6   :  { %1025 = vmatprep.subr.bf16.mxu0 %v1877_v2 }
  0xd9   :  { %1026 = vmatpush1.bf16.msra.mxu0 %v1875_v5  ;;  %v2001_v5 = vld [vmem:[#allocation8 + $0x48] sm:$0xff]  }
  0xda   :  { %1027 = vmatprep.subr.bf16.mxu0 %v1883_v6  ;;  %v2002_v6 = vld [vmem:[#allocation8 + $0x8] sm:$0xff]  }
  0xdd   :  { %1028 = vmatpush1.bf16.msra.mxu0 %v1881_v9  ;;  %v2005_v9 = vld [vmem:[#allocation8 + $0x58] sm:$0xff]  }
  0xde   :  { %1029 = vmatprep.subr.bf16.mxu0 %v1889_v10  ;;  %v2006_v10 = vld [vmem:[#allocation8 + $0x18] sm:$0xff]  }
  0xe1   :  { %1030 = vmatpush1.bf16.msra.mxu0 %v1887_v13  ;;  %v2009_v13 = vld [vmem:[#allocation8 + $0x68] sm:$0xff]  }
  0xe2   :  { %1031 = vmatprep.subr.bf16.mxu0 %v1895_v14  ;;  %v2010_v14 = vld [vmem:[#allocation8 + $0x28] sm:$0xff]  }
  0xe5   :  { %1032 = vmatpush1.bf16.msra.mxu0 %v1893_v17  ;;  %v2013_v17 = vld [vmem:[#allocation8 + $0x78] sm:$0xff]  }
  0xe6   :  { %1033 = vmatprep.subr.bf16.mxu0 %v1901_v18  ;;  %v2014_v18 = vld [vmem:[#allocation8 + $0x38] sm:$0xff]  }
  0xe9   :  { %1034 = vmatpush1.bf16.msra.mxu0 %v1899_v20  ;;  %v1101_v20 = vrot.slane %v1096_v19, %v220_v52 }
  0xea   :  { %1035 = vmatprep.subr.bf16.mxu0 %v1907_v21  ;;  %v1105_v21 = vrot.slane %v1096_v19, %v224_v54 }
  0xed   :  { %1036 = vmatpush1.bf16.msra.mxu0 %v1905_v22 }
  0xee   :  { %1037 = vmatprep.subr.bf16.mxu0 %v1913_v23 }
  0xf1   :  { %1038 = vmatpush1.bf16.msra.mxu0 %v1911_v24 }
  0xf2   :  { %1039 = vmatprep.subr.bf16.mxu0 %v1919_v25 }
  0xf5   :  { %1040 = vmatpush1.bf16.msra.mxu0 %v1917_v26 }
  0xf6   :  { %1041 = vmatprep.subr.bf16.mxu0 %v1925_v27 }
  0xf9   :  { %1042 = vmatpush1.bf16.msra.mxu0 %v1923_v28 }
  0xfa   :  { %1043 = vmatprep.subr.bf16.mxu0 %v1931_v29 }
  0xfd   :  { %1044 = vmatpush1.bf16.msra.mxu0 %v1929_v30 }
  0xfe   :  { %1045 = vmatprep.subr.bf16.mxu0 %v1937_v31 }
 0x101   :  { %1046 = vmatpush1.bf16.msra.mxu0 %v1935_v32 }
 0x102   :  { %1047 = vmatprep.subr.bf16.mxu0 %v1943_v33 }
 0x105   :  { %1048 = vmatpush1.bf16.msra.mxu0 %v1941_v34 }
 0x106   :  { %1049 = vmatprep.subr.bf16.mxu0 %v1948_v35 }
 0x109   :  { %1050 = vmatpush1.bf16.msra.mxu0 %v1946_v36 }
 0x10c   :  { %1052 = vmatmul.mubr.bf16.vlgmr.msra.gmra.mrb[0].mxu0 %v1528_v37 }
 0x168   :  { %v930_v45 = vpop.f32.mrb[0].mxu1 }
 0x169   :  { %v932_v47 = vpop.f32.mrb[1].mxu1  ;;  %v931_v57 = vadd.f32 %v930_v45, %v221_v55 }
 0x16a   :  { %v934_v48 = vpop.f32.mrb[2].mxu1  ;;  %v933_v58 = vadd.f32 %v932_v47, %v225_v56 }
 0x16b   :  { %v935_v49 = vpop.f32.mrb[3].mxu1 }
 0x1df   :  { %v1053_v59 = vpop.f32.mrb[0].mxu0 }
 0x1e0   :  { %v1730_v60 = vadd.f32 %v1053_v59, %v931_v57  ;;  %v1055_v61 = vpop.f32.mrb[1].mxu0 }
 0x1e1   :  { %v1732_v62 = vadd.f32 %v1055_v61, %v933_v58  ;;  %v1057_v63 = vpop.f32.mrb[2].mxu0 }
 0x1e2   :  { %v1060_v46 = vmax.f32 %v1730_v60, 0.0  ;;  %v1058_v0 = vpop.f32.mrb[3].mxu0 }
 0x1e3   :  { %v1061_v1 = vmax.f32 %v1732_v62, 0.0 }
 0x1e4   :  { %v1062_v4 = vpack.c.bf16 %v1060_v46, %v1060_v46 }
 0x1e5   :  { %v1063_v2 = vpack.c.bf16 %v1061_v1, %v1061_v1 }
 0x1e7   :  { %1300 = vmatprep.mubr.bf16.mxu1 %v1063_v2 }
 0x1e8   :  { %1301 = vmatmul.mubr.bf16.vlgmr.msra.gmra.mrb[4].mxu1 %v1062_v4 }
 0x1e9   :  { %1708 = vmatpush3.bf16.msra.mxu1 %v2000_v3 }
 0x1ea   :  { %1709 = vmatprep.subr.bf16.mxu1 %v2001_v5 }
 0x1ed   :  { %1710 = vmatpush3.bf16.msra.mxu1 %v2002_v6 }
 0x1ee   :  { %1711 = vmatprep.subr.bf16.mxu1 %v2003_v7 }
 0x1f1   :  { %1712 = vmatpush3.bf16.msra.mxu1 %v2004_v8 }
 0x1f2   :  { %1713 = vmatprep.subr.bf16.mxu1 %v2005_v9 }
 0x1f5   :  { %1714 = vmatpush3.bf16.msra.mxu1 %v2006_v10 }
 0x1f6   :  { %1715 = vmatprep.subr.bf16.mxu1 %v2007_v11 }
 0x1f9   :  { %1716 = vmatpush3.bf16.msra.mxu1 %v2008_v12 }
 0x1fa   :  { %1717 = vmatprep.subr.bf16.mxu1 %v2009_v13 }
 0x1fd   :  { %1718 = vmatpush3.bf16.msra.mxu1 %v2010_v14 }
 0x1fe   :  { %1719 = vmatprep.subr.bf16.mxu1 %v2011_v15 }
 0x201   :  { %1720 = vmatpush3.bf16.msra.mxu1 %v2012_v16 }
 0x202   :  { %1721 = vmatprep.subr.bf16.mxu1 %v2013_v17 }
 0x205   :  { %1722 = vmatpush3.bf16.msra.mxu1 %v2014_v18 }
 0x2bb   :  { %v1302_v22 = vpop.f32.mrb[4].mxu1 }
 0x2bc   :  { %v1303_v23 = vadd.f32 %v1302_v22, %v1101_v20  ;;  %v1304_v24 = vpop.f32.mrb[5].mxu1 }
 0x2bd   :  { %v1305_v25 = vadd.f32 %v1304_v24, %v1105_v21  ;;  %v1306_v26 = vpop.f32.mrb[6].mxu1 }
 0x2be   :  { %v1309_v27 = vmax.f32 %v1303_v23, 0.0  ;;  %v1307_v28 = vpop.f32.mrb[7].mxu1 }
 0x2bf   :  { %v1310_v29 = vmax.f32 %v1305_v25, 0.0 }
 0x2c0   :  { %1489 = vst [vmem:[#allocation11] sm:$0xff] %v1309_v27  ;;  %v1311_v31 = vpack.c.bf16 %v1309_v27, %v1309_v27 }
 0x2c1   :  { %v1312_v30 = vpack.c.bf16 %v1310_v29, %v1310_v29  ;;  %1490 = vst [vmem:[#allocation11 + $0x8] sm:$0xff] %v1310_v29 }
 0x2c3   :  { %1480 = vmatprep.mubr.bf16.mxu1 %v1312_v30 }
 0x2c4   :  { %1481 = vmatmul.mubr.bf16.vlgmr.msra.gmra.mrb[8].mxu1 %v1311_v31 }
 0x2c5   :  { %2114 = shalt.err (!%p2111_p8)
}
 0x2c6   :  { %s2115_s17 = scalar_lea.hbm %s2325_s8, 256 }
 0x2c7   :  { %p2116_p9 = scmp.ne.s32.totalorder %s2325_s8, %s2115_s17  ;;  %p2119_p10 = scmp.lt.u32.totalorder %s2115_s17, %s2325_s8 }
 0x2c9   :  { %p2121_p11 = pnand %p2119_p10, %p2116_p9 }
 0x2cb   :  { %2124 = shalt.err (!%p2121_p11)
}
 0x2cc   :  { %1510 = dma.vmem_to_hbm [thread:$0]  %s1508_s12, 256, %s2325_s8, [#allocation12]   ;;  %v1690_v33 = vld [vmem:[%s2323_s6] ss:$0 sm:$0xff] }
 0x2cd   :  { %s2166_s26 = smov [#allocation10]  }
 0x2ce   :  { %s1497_s27 = sshll.u32 %s2166_s26, 4  ;;  %s1498_s27 = int_to_ptr.vmem [resolvable:$true] %s1497_s27 }
 0x2cf   :  { %s2125_s29 = scalar_lea.vmem %s1498_s27, 128  ;;  %p2130_p13 = scmp.lt.s32.totalorder %s1498_s27, %s1498_s27 }
 0x2d0   :  { %p2126_p12 = scmp.ne.s32.totalorder %s1498_s27, %s2125_s29  ;;  %p2131_p0 = scmp.lt.s32.totalorder %s2125_s29, %s2125_s29 }
 0x2d2   :  { %p2132_p1 = por %p2131_p0, %p2130_p13 }
 0x2d4   :  { %p2133_p2 = pnand %p2132_p1, %p2126_p12 }
 0x397   :  { %v1723_v32 = vpop.f32.mrb[8].mxu1 }
 0x398   :  { %v1724_v34 = vpop.f32.mrb[9].mxu1 }
 0x399   :  { %v1725_v35 = vadd.f32 %v1724_v34, %v1723_v32  ;;  %v1726_v36 = vpop.f32.mrb[10].mxu1 }
 0x39a   :  { %v1727_v37 = vpop.f32.mrb[11].mxu1 }
 0x39b   :  { %v1483_v38 = vadd.f32 %v1725_v35, %v1690_v33 }
 0x39d   :  { %1488 = vst [vmem:[#allocation10] sm:$0xff] %v1483_v38 }
 0x39e   :  { %2136 = shalt.err (!%p2133_p2)
}
 0x39f   :  { %s2137_s6 = scalar_lea.hbm %s2324_s7, 128 }
 0x3a0   :  { %p2138_p3 = scmp.ne.s32.totalorder %s2324_s7, %s2137_s6  ;;  %p2141_p4 = scmp.lt.u32.totalorder %s2137_s6, %s2324_s7 }
 0x3a2   :  { %p2143_p5 = pnand %p2141_p4, %p2138_p3 }
 0x3a4   :  { %2146 = shalt.err (!%p2143_p5)
}
 0x3a5   :  { %1500 = dma.vmem_to_hbm [thread:$0]  %s1498_s27, 128, %s2324_s7, [#allocation4]  }
 0x3a6   :  { %2153 = dma.done.wait [#allocation4], 128  }
 0x3a7   :  { %2154 = vsyncadd [#allocation4], 4294967168 }
 0x3a8   :  { %2155 = dma.done.wait [#allocation12], 256  }
 0x3a9   :  { %2156 = vsyncadd [#allocation12], 4294967040 }
 0x3aa   :  { %1517 = vsyncpa [#allocation3], 1 }
 0x3ab   :  { %1518 = vsyncpa [#allocation6], 1 }
 0x3ac   :  { %1519 = vsyncpa [#allocation9], 1 }
 0x3ad   :  { %1520 = vsyncpa [#allocation4], 1 }
 0x3ae   :  { %1521 = vsyncpa [#allocation12], 1 }

</bundles_post_ra>
